<compile_context>
chip_gen: v6e
topology: v6e:2x2x1
jax: 0.10.0
libtpu: 0.0.40
codegen_flags: <defaults>
</compile_context>

<pallas_src>
import math
import functools

import jax
import jax.numpy as jnp
from jax import lax
from jax.experimental import pallas as pl
from jax.experimental.pallas import tpu as pltpu


# ---------------------------------------------------------------------------
# Generation-aware VMEM budget
# ---------------------------------------------------------------------------
def _vmem_limit_bytes():
    try:
        cap = pltpu.get_tpu_info().vmem_capacity_bytes
    except Exception:
        cap = 64 * 1024 * 1024          # conservative (v7x-sized physical VMEM)
    return int(cap) * 3 // 4            # ~25% headroom for Mosaic scratch


def _round_up(x, m):
    return ((x + m - 1) // m) * m


def _choose_row_tile(M, max_tile=512, min_programs=2):
    """Sublane-aligned row tile and (possibly padded) row count for the QKV
    grid. Guarantees >= min_programs grid steps when M allows it (so a 2-TC
    v7x chip can shard the parallel axis) and keeps per-step accumulators
    small. Awkward M is handled by padding, never by one giant block."""
    if M <= 8:
        return M, M
    tm = min(max_tile, _round_up(pl.cdiv(M, min_programs), 8))
    m_pad = _round_up(M, tm)
    return tm, m_pad


def _choose_heads_per_block(num_heads, head_dim, seq_len, batch, vmem_budget):
    """Largest head group whose lane width is a multiple of 128 (or the full
    width H) and whose per-step footprint fits the VMEM budget. When batch==1
    prefer groups that leave >=2 programs on the head axis (megacore)."""
    candidates = [d for d in range(1, num_heads + 1)
                  if num_heads % d == 0
                  and ((d * head_dim) % 128 == 0 or d == num_heads)]
    if batch == 1:
        multi = [d for d in candidates if num_heads // d >= 2]
        if multi:
            candidates = multi

    def footprint(hpb):
        w = hpb * head_dim
        tiles = 4 * (seq_len * w * 2) * 2        # q/k/v/ctx bf16, double-buffered
        scores = 3 * seq_len * seq_len * 4       # score/prob f32 temporaries
        parts = hpb * seq_len * head_dim * 4     # per-head f32 ctx before concat
        return tiles + scores + parts

    fitting = [d for d in candidates if footprint(d) <= vmem_budget // 2]
    return max(fitting) if fitting else min(candidates)


def _resident_spec(shape):
    """BlockSpec for an operand resident in VMEM for the whole grid (constant
    index_map): single-buffer it so the unused pipeline buffer does not waste
    VMEM."""
    index_map = lambda *_: (0,) * len(shape)
    try:
        return pl.BlockSpec(shape, index_map, pipeline_mode=pl.Buffered(1))
    except TypeError:   # BlockSpec without pipeline_mode kwarg
        return pl.BlockSpec(shape, index_map)


# ---------------------------------------------------------------------------
# Kernel 1: Q/K/V projection, tiled over M = B*S, resident bf16 weights
# ---------------------------------------------------------------------------
def _qkv_proj_kernel(x_ref, wq_ref, wk_ref, wv_ref, bq_ref, bk_ref, bv_ref,
                     q_ref, k_ref, v_ref, *, mxu_dtype):
    # In-kernel f32 -> bf16 cast of the x tile (rides free VPU slots under the
    # MXU; avoids an extra whole-array XLA cast pass in HBM).
    x = x_ref[...].astype(mxu_dtype)

    def proj(w_ref, b_ref, o_ref):
        # One (TM, H) x (H, H) MXU matmul, f32 accumulate + f32 bias, stored
        # immediately -> only one (TM, H) f32 accumulator live at a time.
        acc = jnp.dot(x, w_ref[...], preferred_element_type=jnp.float32)
        o_ref[...] = (acc + b_ref[...]).astype(o_ref.dtype)

    proj(wq_ref, bq_ref, q_ref)
    proj(wk_ref, bk_ref, k_ref)
    proj(wv_ref, bv_ref, v_ref)


def qkv_projection(x2d, qkv_params, *, mxu_dtype, vmem_limit):
    """x2d: (M, H) f32. Returns q, k, v each (M, H) in mxu_dtype (bf16)."""
    M, H = x2d.shape
    TM, M_pad = _choose_row_tile(M)
    if M_pad != M:
        x2d = jnp.pad(x2d, ((0, M_pad - M), (0, 0)))
    grid = (M_pad // TM,)

    x_spec = pl.BlockSpec((TM, H), lambda i: (i, 0))
    w_spec = _resident_spec((H, H))      # weights stay VMEM-resident
    b_spec = _resident_spec((1, H))
    o_spec = pl.BlockSpec((TM, H), lambda i: (i, 0))
    out_sd = jax.ShapeDtypeStruct((M_pad, H), mxu_dtype)

    q, k, v = pl.pallas_call(
        functools.partial(_qkv_proj_kernel, mxu_dtype=mxu_dtype),
        out_shape=(out_sd, out_sd, out_sd),
        grid=grid,
        in_specs=[x_spec, w_spec, w_spec, w_spec, b_spec, b_spec, b_spec],
        out_specs=(o_spec, o_spec, o_spec),
        compiler_params=pltpu.CompilerParams(
            dimension_semantics=("parallel",),
            vmem_limit_bytes=vmem_limit),
    )(x2d, qkv_params["wq"], qkv_params["wk"], qkv_params["wv"],
      qkv_params["bq"], qkv_params["bk"], qkv_params["bv"])

    if M_pad != M:
        q, k, v = q[:M], k[:M], v[:M]
    return q, k, v


# ---------------------------------------------------------------------------
# Kernel 2: scaled dot-product attention over a (batch, head-group) grid,
#           reading/writing the (B, S, H) layout directly (no HBM transposes)
# ---------------------------------------------------------------------------
def _attention_kernel(q_ref, k_ref, v_ref, mask_ref, ctx_ref, *,
                      scale, hpb, dh):
    mask = mask_ref[0, 0]                       # (1, S) additive, f32
    # One lane-dense load per operand; per-head slices are taken on the
    # loaded values (vreg slices), not on 64-lane ref windows.
    q_all = q_ref[0]                            # (S, W) bf16
    k_all = k_ref[0]
    v_all = v_ref[0]
    mxu_dtype = q_all.dtype

    ctx_parts = []
    for hh in range(hpb):                       # static unrolled head loop
        sl = slice(hh * dh, (hh + 1) * dh)
        q = q_all[:, sl]                        # (S, Dh)
        k = k_all[:, sl]
        v = v_all[:, sl]

        # scores = (q * scale) @ k^T : scale folded into q (Dh-wide, not
        # S-wide), Dh contracted on both operands directly on the MXU
        # (no in-kernel k.T / XLU transpose).
        qs = (q.astype(jnp.float32) * scale).astype(mxu_dtype)
        scores = lax.dot_general(
            qs, k,
            dimension_numbers=(((1,), (1,)), ((), ())),
            preferred_element_type=jnp.float32)            # (S, S) f32
        scores = scores + mask

        # Numerically stable softmax; the 1/sum is folded into the (S, Dh)
        # context (Dh-wide multiply), reciprocal on the EUP.
        # TODO(synk): approx reciprocal (~1e-3 rel err) is inference-grade.
        m = jnp.max(scores, axis=-1, keepdims=True)
        p = jnp.exp(scores - m)
        l = jnp.sum(p, axis=-1, keepdims=True)

        ctx = jnp.dot(p.astype(mxu_dtype), v,
                      preferred_element_type=jnp.float32)  # (S, Dh) f32
        ctx_parts.append(ctx * pl.reciprocal(l, approx=True))

    # Single full-width lane-dense store (unmasked vst stream).
    ctx_ref[0] = jnp.concatenate(ctx_parts, axis=-1).astype(ctx_ref.dtype)


def attention(q, k, v, mask, scale, num_heads, *, out_dtype, vmem_limit):
    """q, k, v: (B, S, H) bf16; mask: (B, 1, 1, S) additive f32."""
    B, S, H = q.shape
    Dh = H // num_heads
    HPB = _choose_heads_per_block(num_heads, Dh, S, B, vmem_limit)
    W = HPB * Dh
    grid = (B, num_heads // HPB)

    blk = pl.BlockSpec((1, S, W), lambda b, g: (b, 0, g))
    mask_spec = pl.BlockSpec((1, 1, 1, S), lambda b, g: (b, 0, 0, 0))

    return pl.pallas_call(
        functools.partial(_attention_kernel, scale=scale, hpb=HPB, dh=Dh),
        out_shape=jax.ShapeDtypeStruct((B, S, H), out_dtype),
        grid=grid,
        in_specs=[blk, blk, blk, mask_spec],
        out_specs=blk,
        compiler_params=pltpu.CompilerParams(
            dimension_semantics=("parallel", "parallel"),
            vmem_limit_bytes=vmem_limit),
    )(q, k, v, mask)


# ---------------------------------------------------------------------------
# Module wrapper
# ---------------------------------------------------------------------------
def prepare_qkv_params(params, mxu_dtype=jnp.bfloat16):
    """One-time parameter prep (parameter-load time, NOT per forward call):
    (in, out) weights cast to the MXU dtype, biases as (1, H) f32 rows."""
    H = params["wq"].shape[0]
    return {
        "wq": params["wq"].astype(mxu_dtype),
        "wk": params["wk"].astype(mxu_dtype),
        "wv": params["wv"].astype(mxu_dtype),
        "bq": params["bq"].reshape(1, H).astype(jnp.float32),
        "bk": params["bk"].reshape(1, H).astype(jnp.float32),
        "bv": params["bv"].reshape(1, H).astype(jnp.float32),
    }


def bert_self_attention(hidden_states, attention_mask, qkv_params,
                        num_attention_heads, *, mxu_dtype=jnp.bfloat16,
                        out_dtype=jnp.bfloat16):
    """Forward pass of BertSelfAttention ('absolute', eval mode).
    Returns context_layer of shape (B, S, H) in out_dtype (bf16 by default)."""
    B, S, H = hidden_states.shape
    Dh = H // num_attention_heads
    scale = 1.0 / math.sqrt(Dh)
    vmem_limit = _vmem_limit_bytes()

    if attention_mask is None:
        attention_mask = jnp.zeros((B, 1, 1, S), jnp.float32)
    attention_mask = attention_mask.astype(jnp.float32)

    x2d = hidden_states.reshape(B * S, H)                 # free reshape
    q2d, k2d, v2d = qkv_projection(x2d, qkv_params, mxu_dtype=mxu_dtype,
                                   vmem_limit=vmem_limit)

    q = q2d.reshape(B, S, H)                              # free reshapes
    k = k2d.reshape(B, S, H)
    v = v2d.reshape(B, S, H)

    # Head split / merge is expressed through BlockSpec index_maps inside the
    # attention kernel; output is already (B, S, H) == context_layer, so the
    # PyTorch permute(0,2,1,3).view(...) disappears.
    return attention(q, k, v, attention_mask, scale, num_attention_heads,
                     out_dtype=out_dtype, vmem_limit=vmem_limit)


# ---------------------------------------------------------------------------
# Pure-JAX reference (f32) for correctness
# ---------------------------------------------------------------------------
def _reference(hidden_states, attention_mask, params, num_attention_heads):
    B, S, H = hidden_states.shape
    Dh = H // num_attention_heads
    scale = 1.0 / math.sqrt(Dh)

    def to_heads(t):
        return t.reshape(B, S, num_attention_heads, Dh).transpose(0, 2, 1, 3)

    q = to_heads(hidden_states @ params["wq"] + params["bq"])
    k = to_heads(hidden_states @ params["wk"] + params["bk"])
    v = to_heads(hidden_states @ params["wv"] + params["bv"])
    scores = jnp.einsum("bhqd,bhkd->bhqk", q, k) * scale + attention_mask
    probs = jax.nn.softmax(scores, axis=-1)
    ctx = jnp.einsum("bhqk,bhkd->bhqd", probs, v)
    return ctx.transpose(0, 2, 1, 3).reshape(B, S, H)


if __name__ == "__main__":
    # Small config: batch=2, seq=8, hidden=32, heads=4 (head_dim=8)
    B, S, H, nH = 2, 8, 32, 4

    key = jax.random.PRNGKey(0)
    kx, kq, kk, kv, kbq, kbk, kbv = jax.random.split(key, 7)

    hidden_states = jax.random.normal(kx, (B, S, H), dtype=jnp.float32)

    params = {
        "wq": 0.02 * jax.random.normal(kq, (H, H), dtype=jnp.float32),
        "wk": 0.02 * jax.random.normal(kk, (H, H), dtype=jnp.float32),
        "wv": 0.02 * jax.random.normal(kv, (H, H), dtype=jnp.float32),
        "bq": 0.01 * jax.random.normal(kbq, (H,), dtype=jnp.float32),
        "bk": 0.01 * jax.random.normal(kbk, (H,), dtype=jnp.float32),
        "bv": 0.01 * jax.random.normal(kbv, (H,), dtype=jnp.float32),
    }

    # Additive attention mask (B, 1, 1, S): mask out the last 2 keys of batch 1.
    valid = jnp.ones((B, S), dtype=jnp.float32)
    valid = valid.at[1, -2:].set(0.0)
    attention_mask = ((1.0 - valid) * -1e9).reshape(B, 1, 1, S)

    # Parameter prep happens once, outside the forward path.
    qkv_params = prepare_qkv_params(params, mxu_dtype=jnp.bfloat16)

    out = bert_self_attention(hidden_states, attention_mask, qkv_params, nH)
    out = jax.block_until_ready(out)

    ref = _reference(hidden_states, attention_mask, params, nH)
    # bf16 intermediates / outputs -> loosened tolerance vs. the f32 reference
    # (expected quantization drift, not a bug).
    if not jnp.allclose(out.astype(jnp.float32), ref, atol=2e-2, rtol=2e-2):
        raise AssertionError("Pallas output does not match reference")

    print("KERNEL_OK")
</pallas_src>

<mosaic_0001>
module attributes {stable_mosaic.version = 11 : i64} {
  func.func @_qkv_proj_kernel(%arg0: i32, %arg1: memref<8x32xf32, #tpu.memory_space<vmem>>, %arg2: memref<32x32xbf16, #tpu.memory_space<vmem>>, %arg3: memref<32x32xbf16, #tpu.memory_space<vmem>>, %arg4: memref<32x32xbf16, #tpu.memory_space<vmem>>, %arg5: memref<1x32xf32, #tpu.memory_space<vmem>>, %arg6: memref<1x32xf32, #tpu.memory_space<vmem>>, %arg7: memref<1x32xf32, #tpu.memory_space<vmem>>, %arg8: memref<8x32xbf16, #tpu.memory_space<vmem>>, %arg9: memref<8x32xbf16, #tpu.memory_space<vmem>>, %arg10: memref<8x32xbf16, #tpu.memory_space<vmem>>) attributes {dimension_semantics = [#tpu.dimension_semantics<parallel>], iteration_bounds = array<i64: 2>, scalar_prefetch = 0 : i64, scratch_operands = 0 : i64, tpu.core_type = #tpu.core_type<tc>, window_params = [{transform_indices = @transform_0, window_bounds = array<i64: 8, 32>}, {pipeline_mode = #tpu.pipeline_mode<synchronous>, transform_indices = @transform_1, window_bounds = array<i64: 32, 32>}, {pipeline_mode = #tpu.pipeline_mode<synchronous>, transform_indices = @transform_2, window_bounds = array<i64: 32, 32>}, {pipeline_mode = #tpu.pipeline_mode<synchronous>, transform_indices = @transform_3, window_bounds = array<i64: 32, 32>}, {pipeline_mode = #tpu.pipeline_mode<synchronous>, transform_indices = @transform_4, window_bounds = array<i64: 1, 32>}, {pipeline_mode = #tpu.pipeline_mode<synchronous>, transform_indices = @transform_5, window_bounds = array<i64: 1, 32>}, {pipeline_mode = #tpu.pipeline_mode<synchronous>, transform_indices = @transform_6, window_bounds = array<i64: 1, 32>}, {transform_indices = @transform_7, window_bounds = array<i64: 8, 32>}, {transform_indices = @transform_8, window_bounds = array<i64: 8, 32>}, {transform_indices = @transform_9, window_bounds = array<i64: 8, 32>}]} {
    %c0 = arith.constant 0 : index
    %c0_0 = arith.constant 0 : index
    %0 = vector.load %arg1[%c0, %c0_0] : memref<8x32xf32, #tpu.memory_space<vmem>>, vector<8x32xf32>
    %1 = arith.truncf %0 : vector<8x32xf32> to vector<8x32xbf16>
    %c0_1 = arith.constant 0 : index
    %c0_2 = arith.constant 0 : index
    %2 = vector.load %arg2[%c0_1, %c0_2] : memref<32x32xbf16, #tpu.memory_space<vmem>>, vector<32x32xbf16>
    %cst = arith.constant dense<0.000000e+00> : vector<8x32xf32>
    %3 = tpu.matmul %1, %2, %cst {dimension_numbers = #tpu.dot_dimension_numbers<[1], [0], [0], [1], [0, 0, 1, 1], [], []>} : vector<8x32xbf16>, vector<32x32xbf16>, vector<8x32xf32> -> vector<8x32xf32>
    %c0_3 = arith.constant 0 : index
    %c0_4 = arith.constant 0 : index
    %4 = vector.load %arg5[%c0_3, %c0_4] : memref<1x32xf32, #tpu.memory_space<vmem>>, vector<1x32xf32>
    %5 = vector.broadcast %4 : vector<1x32xf32> to vector<8x32xf32>
    %6 = arith.addf %3, %5 : vector<8x32xf32>
    %7 = arith.truncf %6 : vector<8x32xf32> to vector<8x32xbf16>
    %c0_5 = arith.constant 0 : index
    %c0_6 = arith.constant 0 : index
    %8 = vector.load %arg8[%c0_5, %c0_6] : memref<8x32xbf16, #tpu.memory_space<vmem>>, vector<8x32xbf16>
    tpu.vector_store %arg8[%c0_5, %c0_6], %7 {strides = array<i32>} : memref<8x32xbf16, #tpu.memory_space<vmem>>, vector<8x32xbf16>,
    %c0_7 = arith.constant 0 : index
    %c0_8 = arith.constant 0 : index
    %9 = vector.load %arg3[%c0_7, %c0_8] : memref<32x32xbf16, #tpu.memory_space<vmem>>, vector<32x32xbf16>
    %cst_9 = arith.constant dense<0.000000e+00> : vector<8x32xf32>
    %10 = tpu.matmul %1, %9, %cst_9 {dimension_numbers = #tpu.dot_dimension_numbers<[1], [0], [0], [1], [0, 0, 1, 1], [], []>} : vector<8x32xbf16>, vector<32x32xbf16>, vector<8x32xf32> -> vector<8x32xf32>
    %c0_10 = arith.constant 0 : index
    %c0_11 = arith.constant 0 : index
    %11 = vector.load %arg6[%c0_10, %c0_11] : memref<1x32xf32, #tpu.memory_space<vmem>>, vector<1x32xf32>
    %12 = vector.broadcast %11 : vector<1x32xf32> to vector<8x32xf32>
    %13 = arith.addf %10, %12 : vector<8x32xf32>
    %14 = arith.truncf %13 : vector<8x32xf32> to vector<8x32xbf16>
    %c0_12 = arith.constant 0 : index
    %c0_13 = arith.constant 0 : index
    %15 = vector.load %arg9[%c0_12, %c0_13] : memref<8x32xbf16, #tpu.memory_space<vmem>>, vector<8x32xbf16>
    tpu.vector_store %arg9[%c0_12, %c0_13], %14 {strides = array<i32>} : memref<8x32xbf16, #tpu.memory_space<vmem>>, vector<8x32xbf16>,
    %c0_14 = arith.constant 0 : index
    %c0_15 = arith.constant 0 : index
    %16 = vector.load %arg4[%c0_14, %c0_15] : memref<32x32xbf16, #tpu.memory_space<vmem>>, vector<32x32xbf16>
    %cst_16 = arith.constant dense<0.000000e+00> : vector<8x32xf32>
    %17 = tpu.matmul %1, %16, %cst_16 {dimension_numbers = #tpu.dot_dimension_numbers<[1], [0], [0], [1], [0, 0, 1, 1], [], []>} : vector<8x32xbf16>, vector<32x32xbf16>, vector<8x32xf32> -> vector<8x32xf32>
    %c0_17 = arith.constant 0 : index
    %c0_18 = arith.constant 0 : index
    %18 = vector.load %arg7[%c0_17, %c0_18] : memref<1x32xf32, #tpu.memory_space<vmem>>, vector<1x32xf32>
    %19 = vector.broadcast %18 : vector<1x32xf32> to vector<8x32xf32>
    %20 = arith.addf %17, %19 : vector<8x32xf32>
    %21 = arith.truncf %20 : vector<8x32xf32> to vector<8x32xbf16>
    %c0_19 = arith.constant 0 : index
    %c0_20 = arith.constant 0 : index
    %22 = vector.load %arg10[%c0_19, %c0_20] : memref<8x32xbf16, #tpu.memory_space<vmem>>, vector<8x32xbf16>
    tpu.vector_store %arg10[%c0_19, %c0_20], %21 {strides = array<i32>} : memref<8x32xbf16, #tpu.memory_space<vmem>>, vector<8x32xbf16>,
    return
  }
  func.func @transform_0(%arg0: i32) -> (i32, i32) {
    %c0_i32 = arith.constant 0 : i32
    %c0_i32_0 = arith.constant 0 : i32
    return %arg0, %c0_i32 : i32, i32
  }
  func.func @transform_1(%arg0: i32) -> (i32, i32) {
    %c0_i32 = arith.constant 0 : i32
    %c0_i32_0 = arith.constant 0 : i32
    %c0_i32_1 = arith.constant 0 : i32
    return %c0_i32, %c0_i32_0 : i32, i32
  }
  func.func @transform_2(%arg0: i32) -> (i32, i32) {
    %c0_i32 = arith.constant 0 : i32
    %c0_i32_0 = arith.constant 0 : i32
    %c0_i32_1 = arith.constant 0 : i32
    return %c0_i32, %c0_i32_0 : i32, i32
  }
  func.func @transform_3(%arg0: i32) -> (i32, i32) {
    %c0_i32 = arith.constant 0 : i32
    %c0_i32_0 = arith.constant 0 : i32
    %c0_i32_1 = arith.constant 0 : i32
    return %c0_i32, %c0_i32_0 : i32, i32
  }
  func.func @transform_4(%arg0: i32) -> (i32, i32) {
    %c0_i32 = arith.constant 0 : i32
    %c0_i32_0 = arith.constant 0 : i32
    %c0_i32_1 = arith.constant 0 : i32
    return %c0_i32, %c0_i32_0 : i32, i32
  }
  func.func @transform_5(%arg0: i32) -> (i32, i32) {
    %c0_i32 = arith.constant 0 : i32
    %c0_i32_0 = arith.constant 0 : i32
    %c0_i32_1 = arith.constant 0 : i32
    return %c0_i32, %c0_i32_0 : i32, i32
  }
  func.func @transform_6(%arg0: i32) -> (i32, i32) {
    %c0_i32 = arith.constant 0 : i32
    %c0_i32_0 = arith.constant 0 : i32
    %c0_i32_1 = arith.constant 0 : i32
    return %c0_i32, %c0_i32_0 : i32, i32
  }
  func.func @transform_7(%arg0: i32) -> (i32, i32) {
    %c0_i32 = arith.constant 0 : i32
    %c0_i32_0 = arith.constant 0 : i32
    return %arg0, %c0_i32 : i32, i32
  }
  func.func @transform_8(%arg0: i32) -> (i32, i32) {
    %c0_i32 = arith.constant 0 : i32
    %c0_i32_0 = arith.constant 0 : i32
    return %arg0, %c0_i32 : i32, i32
  }
  func.func @transform_9(%arg0: i32) -> (i32, i32) {
    %c0_i32 = arith.constant 0 : i32
    %c0_i32_0 = arith.constant 0 : i32
    return %arg0, %c0_i32 : i32, i32
  }
}

</mosaic_0001>

<bundles_post_ra>
// kernel: tpu_custom_call.1
= control target key start
LH: loop header
LB: loop body
LE: loop exit
PB: predicated region body
PF: predicated region fallthrough
CT: control target
= control target key end

     0   :  { %s1560_s0 = inlined_call_operand.hbm [shape: f32[16,32], index: 0, kind: input, shape index: {}]   ;;  %s1561_s1 = inlined_call_operand.hbm [shape: bf16[32,32], index: 1, kind: input, shape index: {}]   ;;  %s1562_s2 = inlined_call_operand.hbm [shape: bf16[32,32], index: 2, kind: input, shape index: {}]   ;;  %s1563_s3 = inlined_call_operand.hbm [shape: bf16[32,32], index: 3, kind: input, shape index: {}]   ;;  %s1564_s4 = inlined_call_operand.vmem [shape: f32[1,32], index: 4, kind: input, shape index: {}]   ;;  %s1565_s5 = inlined_call_operand.vmem [shape: f32[1,32], index: 5, kind: input, shape index: {}]   ;;  %s1566_s6 = inlined_call_operand.vmem [shape: f32[1,32], index: 6, kind: input, shape index: {}]   ;;  %s1567_s7 = inlined_call_operand.hbm [shape: bf16[16,32], index: 7, kind: output, shape index: {0}]   ;;  %s1568_s8 = inlined_call_operand.hbm [shape: bf16[16,32], index: 8, kind: output, shape index: {1}]   ;;  %s1569_s9 = inlined_call_operand.hbm [shape: bf16[16,32], index: 9, kind: output, shape index: {2}]  }
   0x1   :  { %1575 = sst [smem:[#allocation20_spill]] %s1561_s1 }
   0x2   :  { %1576 = sst [smem:[#allocation21_spill]] %s1562_s2 }
   0x3   :  { %1577 = sst [smem:[#allocation22_spill]] %s1563_s3 }
   0x4   :  { %15 = vsyncpa [#allocation3], 0 }
   0x5   :  { %17 = vsyncpa [#allocation3 + $0x1], 0 }
   0x6   :  { %18 = vsyncpa [#allocation6], 0 }
   0x7   :  { %19 = vsyncpa [#allocation9], 0 }
   0x8   :  { %20 = vsyncpa [#allocation4], 0 }
   0x9   :  { %22 = vsyncpa [#allocation4 + $0x1], 0 }
   0xa   :  { %23 = vsyncpa [#allocation12], 0 }
   0xb   :  { %25 = vsyncpa [#allocation12 + $0x1], 0  ;;  %s1286_s30 = smov 0   ;;  %s1288_s10 = smov 0  }
   0xc   :  { %s1290_s11 = smov 0   ;;  %s1292_s12 = smov 0  }
   0xd LB: > { %s1307_s13 = sadd.s32 4294967295, %s1223_s12   ;;  %s1572_s14 = sadd.s32 4294967294, %s1223_s12   ;;  %s1223_s12 = sphi %s1292_s12, %s1604_s12   ;;  %s1219_s11 = sphi %s1290_s11, %s1603_s11   ;;  %s1215_s10 = sphi %s1288_s10, %s1602_s10   ;;  %s1211_s30 = sphi %s1286_s30, %s1601_s30  }
   0xe   : > { %p51_p0 = scmp.ne.s32.totalorder %s1215_s10, %s1211_s30  ;;  %p1570_p1 = scmp.eq.s32.totalorder %s1307_s13, 0 }
   0xf   : > { %p207_p3 = scmp.eq.s32.totalorder %s1572_s14, 1  ;;  %p824_p5 = scmp.ge.s32.totalorder %s1223_s12, 1 }
  0x10   : > { %p1318_p4 = por %p1570_p1, %p51_p0  ;;  %p266_p7 = scmp.lt.s32.totalorder %s1223_s12, 3 }
  0x11   : > { %p1323_p6 = por %p207_p3, %p51_p0  ;;  %s1225_s18 = smov [#allocation5]  }
  0x12   : > { %s1578_s15 = scalar_select %p1318_p4, 1, 0 }
  0x13   : > { %s1579_s16 = scalar_select %p1323_p6, 1, 0 }
  0x14   : > { %p1328_p8 = pnand %p824_p5, %p266_p7  ;;  %s278_s19 = sshll.u32 %s1225_s18, 4  ;;  %s279_s19 = int_to_ptr.vmem [resolvable:$true] %s278_s19 }
  0x15   : > { %s1226_s21 = smov [#allocation7]   ;;  %s1227_s23 = smov [#allocation8]  }
  0x16   : > { %s1580_s17 = scalar_select %p1328_p8, 1, 0 }
  0x17   : > { %p912_p9 = pneg %p1328_p8  ;;  %s291_s22 = sshll.u32 %s1226_s21, 4  ;;  %s292_s22 = int_to_ptr.vmem [resolvable:$true] %s291_s22 }
  0x18   : > { %s304_s24 = sshll.u32 %s1227_s23, 4  ;;  %s1000_s25 = scalar_lea.vmem %s279_s19, 256  ;;  %s305_s24 = int_to_ptr.vmem [resolvable:$true] %s304_s24 }
  0x19   : > { %p1337_p11 = pnand %p912_p9, %p1570_p1  ;;  %p1001_p13 = scmp.ne.s32.totalorder %s279_s19, %s1000_s25 }
  0x1a   : > { %p1008_p5 = scmp.lt.s32.totalorder %s279_s19, %s279_s19  ;;  %p1009_p7 = scmp.lt.s32.totalorder %s1000_s25, %s1000_s25 }
  0x1b   : > { %p991_p12 = pneg %p1337_p11 }
  0x1c   : > { %p1010_p9 = por %p1009_p7, %p1008_p5 }
  0x1d   : > { %p1003_p0 = pnand %p1001_p13, %p991_p12 }
  0x1f   : > { %p1004_p3 = pneg %p1003_p0 }
  0x21   : > { %p1011_p10 = pnand %p1010_p9, %p1004_p3 }
  0x23   : > { %1014 = shalt.err (!%p1011_p10)
}
  0x24   : > { %s1228_s26 = smov 64   ;;  %s1229_s27 = smov 4  }
  0x25   : > { %s1582_s1 = sld [smem:[#allocation20_spill]]  ;;  %s1026_s18 = scalar_lea.vmem %s292_s22, 256 }
  0x26   : > { %p1027_p1 = scmp.ne.s32.totalorder %s292_s22, %s1026_s18  ;;  %p1034_p2 = scmp.lt.s32.totalorder %s292_s22, %s292_s22 }
  0x27   : > { %p1035_p6 = scmp.lt.s32.totalorder %s1026_s18, %s1026_s18 }
  0x28   : > { %p1029_p13 = pnand %p1027_p1, %p991_p12 }
  0x29   : > { %p1036_p5 = por %p1035_p6, %p1034_p2 }
  0x2a   : > { %p1030_p0 = pneg %p1029_p13 }
  0x2b   : > { %915 = dma.hbm_to_vmem [thread:$0]  (!%p1337_p11), %s1582_s1, 256, %s279_s19, [#allocation6], %s1228_s26, %s1228_s26, %s1229_s27  }
  0x2c   : > { %p1037_p3 = pnand %p1036_p5, %p1030_p0 }
  0x2e   : > { %1040 = shalt.err (!%p1037_p3)
}
  0x2f   : > { %s1583_s2 = sld [smem:[#allocation21_spill]]  ;;  %s1052_s19 = scalar_lea.vmem %s305_s24, 256 }
  0x30   : > { %p1053_p10 = scmp.ne.s32.totalorder %s305_s24, %s1052_s19  ;;  %p1060_p9 = scmp.lt.s32.totalorder %s305_s24, %s305_s24 }
  0x31   : > { %p1061_p13 = scmp.lt.s32.totalorder %s1052_s19, %s1052_s19 }
  0x32   : > { %p1055_p7 = pnand %p1053_p10, %p991_p12 }
  0x33   : > { %p1062_p4 = por %p1061_p13, %p1060_p9 }
  0x34   : > { %p1056_p1 = pneg %p1055_p7 }
  0x35   : > { %918 = dma.hbm_to_vmem [thread:$0]  (!%p1337_p11), %s1583_s2, 256, %s292_s22, [#allocation6], %s1228_s26, %s1228_s26, %s1229_s27  }
  0x36   : > { %p1063_p2 = pnand %p1062_p4, %p1056_p1 }
  0x38   : > { %1066 = shalt.err (!%p1063_p2)
}
  0x39   : > { %s1584_s3 = sld [smem:[#allocation22_spill]]  ;;  %s1368_s22 = sadd.s32 1, %s1223_s12  }
  0x3a   : > { %s35_s29 = ssub.s32 %s1223_s12, %s1368_s22  ;;  %s38_s20 = sadd.s32 1, %s1219_s11 }
  0x3b   : > { %p36_p4 = scmp.eq.s32.totalorder %s35_s29, 0  ;;  %p45_p6 = scmp.ne.s32.totalorder %s1219_s11, %s1215_s10 }
  0x3c   : > { %p46_p12 = scmp.eq.s32.totalorder %s1223_s12, 0  ;;  %p939_p0 = scmp.lt.s32.totalorder %s1223_s12, 2 }
  0x3d   : > { %s1378_s18 = scalar_select %p36_p4, %s1219_s11, %s38_s20  }
  0x3e   : > { %p47_p5 = por %p46_p12, %p45_p6  ;;  %p1586_p3 = scmp.eq.s32.totalorder %s1307_s13, 1 }
  0x3f   : > { %921 = dma.hbm_to_vmem [thread:$0]  (!%p1337_p11), %s1584_s3, 256, %s305_s24, [#allocation9], %s1228_s26, %s1228_s26, %s1229_s27  }
  0x40   : > { %1585 = sst [smem:[#allocation19_spill]] %s1378_s18  ;;  %p1382_p10 = por %p1586_p3, %p45_p6 }
  0x41   : > { %s327_s23 = sand.u32 1, %s1219_s11   ;;  %s830_s19 = sshll.u32 %s1223_s12, 7 }
  0x42   : > { %s1587_s21 = scalar_select %p1382_p10, 1, 0 }
  0x43   : > { %s829_s24 = sshll.u32 %s327_s23, 3  ;;  %s1391_s25 = scalar_lea.hbm %s1560_s0, %s830_s19 }
  0x44   : > { %s331_s28 = scalar_lea.vmem [#allocation2], %s829_s24  ;;  %p1393_p11 = pnand %p939_p0, %p47_p5 }
  0x45   : > { %s338_s29 = sshll.u32 %s331_s28, 4  ;;  %s328_s14 = scalar_lea.sflag [#allocation3], %s327_s23  ;;  %s339_s29 = int_to_ptr.vmem [resolvable:$true] %s338_s29 }
  0x46   : > { %s1067_s1 = scalar_lea.hbm %s1391_s25, 128  ;;  %p1069_p1 = pneg %p1393_p11 }
  0x47   : > { %p1068_p7 = scmp.ne.s32.totalorder %s1391_s25, %s1067_s1  ;;  %s1072_s27 = scalar_lea.hbm %s1560_s0, 256 }
  0x48   : > { %p1073_p2 = scmp.lt.s32.totalorder %s1391_s25, %s1560_s0  ;;  %p1074_p4 = scmp.lt.s32.totalorder %s1072_s27, %s1067_s1 }
  0x49   : > { %p1070_p9 = pnand %p1069_p1, %p1068_p7 }
  0x4a   : > { %p1075_p6 = por %p1074_p4, %p1073_p2 }
  0x4b   : > { %p1071_p13 = pneg %p1070_p9 }
  0x4d   : > { %p1076_p12 = pnand %p1075_p6, %p1071_p13 }
  0x4f   : > { %1079 = shalt.err (!%p1076_p12)
}
  0x50   : > { %s1080_s28 = scalar_lea.vmem %s339_s29, 128  ;;  %s1230_s23 = smov [#allocation2]  }
  0x51   : > { %p1081_p0 = scmp.ne.s32.totalorder %s339_s29, %s1080_s28  ;;  %s1085_s3 = sshll.u32 %s1230_s23, 4  ;;  %s1086_s3 = int_to_ptr.vmem [resolvable:$false] %s1085_s3 }
  0x52   : > { %s1087_s18 = scalar_lea.vmem %s1086_s3, 256  ;;  %p1088_p7 = scmp.lt.s32.totalorder %s339_s29, %s1086_s3 }
  0x53   : > { %p1083_p5 = pnand %p1081_p0, %p1069_p1  ;;  %p1089_p9 = scmp.lt.s32.totalorder %s1087_s18, %s1080_s28 }
  0x55   : > { %p1084_p3 = pneg %p1083_p5  ;;  %p1090_p10 = por %p1089_p9, %p1088_p7 }
  0x57   : > { %p1091_p8 = pnand %p1090_p10, %p1084_p3 }
  0x59   : > { %1094 = shalt.err (!%p1091_p8)
}
  0x5a   : > { %925 = dma.hbm_to_vmem [thread:$0]  (!%p1393_p11), %s1391_s25, 128, %s339_s29, %s328_s14  }
  0x5b   : > { %p1589_p13 = scmp.ne.s32.totalorder %s1580_s17, 0 }
  0x5c   : > { %s1414_s1 = sand.u32 (!%p1589_p13), 1, %s1215_s10   ;;  %p1590_p1 = scmp.ne.s32.totalorder (!%p1589_p13), %s1578_s15, 0 }
  0x5d   : > { %347 = sbr.rel (%p1589_p13) target bundleno = 372 (0x174), region = 48  ;;  %s832_s2 = sshll.u32 (!%p1589_p13), %s1414_s1, 3 }
  0x5e   : > { %s350_s19 = scalar_lea.sflag (!%p1589_p13), [#allocation3], %s1414_s1  ;;  %s353_s3 = scalar_lea.vmem (!%p1589_p13), [#allocation2], %s832_s2 }
  0x62   : > { %1190 = dma.done.wait (%p1590_p1), %s350_s19, 128  }
  0x63   : > { %1192 = vsyncadd (%p1590_p1), %s350_s19, 4294967168  ;;  %p1591_p8 = scmp.eq.s32.totalorder %s1307_s13, 0 }
  0x65   : > { %1194 = dma.done.wait (%p1591_p8), [#allocation6], 512   ;;  %p1592_p10 = pmov %p1591_p8 }
  0x66   : > { %p1593_p11 = pmov %p1591_p8 }
  0x67   : > { %1196 = vsyncadd (%p1592_p10), [#allocation6], 4294966784 }
  0x68   : > { %1198 = dma.done.wait (%p1593_p11), [#allocation9], 256   ;;  %p1594_p2 = pmov %p1591_p8 }
  0x69   : > { %v1231_v0 = vmov 0.0   ;;  %vm1232_vm0 = vmmov 0   ;;  %v983_v1 = vld [vmem:[#allocation5 + $0x8] sm:$0xff]   ;;  %v984_v2 = vld [vmem:[#allocation7 + $0x8] sm:$0xff]   ;;  %v985_v3 = vld [vmem:[#allocation5] sm:$0xff]   ;;  %vm436_vm1 = vcmask 261120  }
  0x6a   : > { %1200 = vsyncadd (%p1594_p2), [#allocation9], 4294967040  ;;  %868 = vmatprep.subr.bf16.mxu0 %v1231_v0  ;;  %876 = vmatprep.subr.bf16.mxu1 %v1231_v0  ;;  %v986_v4 = vld [vmem:[#allocation7] sm:$0xff]   ;;  %v987_v7 = vld [vmem:[#allocation8 + $0x8] sm:$0xff]   ;;  %s1434_s14 = sshll.u32 %s1414_s1, 2  ;;  %s1444_s20 = sshll.u32 %s1307_s13, 6 }
  0x6b   : > { %872 = vmatprep.mubr.msk.bf16.mxu0 %vm1232_vm0, %v1231_v0  ;;  %880 = vmatprep.mubr.msk.bf16.mxu1 %vm1232_vm0, %v1231_v0  ;;  %v411_v5 = vld [vmem:[%s353_s3] sm:$0xff]  ;;  %v988_v8 = vld [vmem:[#allocation8] sm:$0xff]   ;;  %s395_s26 = scalar_lea.vmem [#allocation10], %s1434_s14  ;;  %s402_s24 = scalar_lea.vmem [#allocation11], %s1434_s14  ;;  %vm481_vm2 = vcmask 257024  }
  0x6c   : > { %869 = vmatpush3.bf16.msra.mxu0 %v983_v1  ;;  %877 = vmatpush3.bf16.msra.mxu1 %v984_v2  ;;  %v412_v6 = vpack.c.bf16 %v411_v5, %v411_v5  ;;  %v839_v9 = vld [vmem:[%s1564_s4] ss:$0 sm:$0xff]  ;;  %s637_s27 = sshll.u32 %s395_s26, 4  ;;  %s650_s28 = sshll.u32 %s402_s24, 4  ;;  %s1454_s27 = int_to_ptr.vmem [resolvable:$true] %s637_s27  ;;  %s1462_s28 = int_to_ptr.vmem [resolvable:$true] %s650_s28 }
  0x6d   : > { %870 = vmatprep.subr.bf16.mxu0 %v1231_v0  ;;  %878 = vmatprep.subr.bf16.mxu1 %v1231_v0  ;;  %v843_v10 = vld [vmem:[%s1565_s5] ss:$0 sm:$0xff]  ;;  %s1452_s19 = scalar_lea.hbm %s1567_s7, %s1444_s20  ;;  %s1460_s17 = scalar_lea.hbm %s1568_s8, %s1444_s20 }
  0x6e   : > { %v847_v22 = vld [vmem:[%s1566_s6] ss:$0 sm:$0xff]  ;;  %s614_s23 = scalar_lea.sflag [#allocation4], %s1414_s1  ;;  %s1095_s2 = scalar_lea.vmem %s1454_s27, 64 }
  0x6f   : > { %p1096_p4 = scmp.ne.s32.totalorder %s1454_s27, %s1095_s2  ;;  %p1595_p6 = scmp.ne.s32.totalorder %s1587_s21, 0 }
  0x70   : > { %871 = vmatpush3.bf16.msra.mxu0 %v985_v3  ;;  %879 = vmatpush3.bf16.msra.mxu1 %v986_v4  ;;  %s1233_s3 = smov [#allocation10]  }
  0x71   : > { %884 = vmatprep.subr.bf16.mxu0 %v1231_v0  ;;  %p1097_p12 = pnand %p1096_p4, %p1595_p6  ;;  %s1099_s15 = sshll.u32 %s1233_s3, 4  ;;  %s1100_s15 = int_to_ptr.vmem [resolvable:$false] %s1099_s15 }
  0x72   : > { %s1101_s29 = scalar_lea.vmem %s1100_s15, 128  ;;  %p1102_p5 = scmp.lt.s32.totalorder %s1454_s27, %s1100_s15 }
  0x73   : > { %873 = vmatmul.mubr.msk.bf16.vlgmr.msra.gmra.mxu0 %vm436_vm1, %v412_v6  ;;  %881 = vmatmul.mubr.msk.bf16.vlgmr.msra.gmra.mxu1 %vm436_vm1, %v412_v6  ;;  %p1098_p0 = pneg %p1097_p12  ;;  %p1103_p3 = scmp.lt.s32.totalorder %s1101_s29, %s1095_s2 }
  0x74   : > { %885 = vmatpush3.bf16.msra.mxu0 %v987_v7  ;;  %888 = vmatprep.mubr.msk.bf16.mxu0 %vm1232_vm0, %v1231_v0 }
  0x75   : > { %886 = vmatprep.subr.bf16.mxu0 %v1231_v0  ;;  %p1104_p7 = por %p1103_p3, %p1102_p5 }
  0x77   : > { %p1105_p9 = pnand %p1104_p7, %p1098_p0 }
  0x78   : > { %887 = vmatpush3.bf16.msra.mxu0 %v988_v8 }
  0x7b   : > { %889 = vmatmul.mubr.msk.bf16.vlgmr.msra.gmra.mxu0 %vm436_vm1, %v412_v6 }
 0x133   : > { %v474_v11 = vpop.f32.mrf.mxu0  ;;  %v540_v13 = vpop.f32.mrf.mxu1 }
 0x134   : > { %v475_v12 = vadd.f32 %v839_v9, %v474_v11  ;;  %v541_v15 = vadd.f32 %v843_v10, %v540_v13 }
 0x135   : > { %v874_v14 = vpop.f32.mrf.mxu0  ;;  %v882_v17 = vpop.f32.mrf.mxu1 }
 0x136   : > { %v480_v16 = vpack.c.bf16 %v475_v12, %v475_v12  ;;  %v546_v18 = vpack.c.bf16 %v541_v15, %v541_v15 }
 0x137   : > { %v477_v19 = vpop.f32.mrf.mxu0  ;;  %v543_v20 = vpop.f32.mrf.mxu1 }
 0x138   : > { %482 = vst.msk [vmem:[%s395_s26] sm:$0xf] %vm481_vm2, %v480_v16  ;;  %547 = vst.msk [vmem:[%s402_s24] sm:$0xf] %vm481_vm2, %v546_v18 }
 0x139   : > { %v875_v21 = vpop.f32.mrf.mxu0 }
 0x13a   : > { %1108 = shalt.err (!%p1105_p9)
}
 0x13b   : > { %s1109_s26 = scalar_lea.hbm %s1452_s19, 64  ;;  %s1113_s18 = scalar_lea.hbm %s1567_s7, 128 }
 0x13c   : > { %p1110_p13 = scmp.ne.s32.totalorder %s1452_s19, %s1109_s26  ;;  %p1114_p10 = scmp.lt.s32.totalorder %s1452_s19, %s1567_s7 }
 0x13d   : > { %p1115_p11 = scmp.lt.s32.totalorder %s1113_s18, %s1109_s26 }
 0x13e   : > { %p1111_p1 = pnand %p1110_p13, %p1595_p6 }
 0x13f   : > { %p1116_p2 = por %p1115_p11, %p1114_p10 }
 0x140   : > { %p1112_p8 = pneg %p1111_p1 }
 0x142   : > { %p1117_p4 = pnand %p1116_p2, %p1112_p8 }
 0x144   : > { %1120 = shalt.err (!%p1117_p4)
}
 0x145   : > { %906 = dma.vmem_to_hbm [thread:$0]  (%p1595_p6), %s1454_s27, 64, %s1452_s19, %s614_s23   ;;  %v883_v23 = vpop.f32.mrf.mxu1 }
 0x146   : > { %s1596_s29 = sand.u32 1, %s1307_s13   ;;  %s1121_s15 = scalar_lea.vmem %s1462_s28, 64 }
 0x147   : > { %s1492_s2 = scalar_lea.sflag [#allocation12], %s1596_s29  ;;  %p1122_p12 = scmp.ne.s32.totalorder %s1462_s28, %s1121_s15 }
 0x148   : > { %s1234_s26 = smov [#allocation11]  }
 0x149   : > { %p1123_p0 = pnand %p1122_p12, %p1595_p6  ;;  %s1125_s1 = sshll.u32 %s1234_s26, 4  ;;  %s1126_s1 = int_to_ptr.vmem [resolvable:$false] %s1125_s1 }
 0x14a   : > { %s1127_s24 = scalar_lea.vmem %s1126_s1, 128  ;;  %p1128_p3 = scmp.lt.s32.totalorder %s1462_s28, %s1126_s1 }
 0x14b   : > { %p1124_p5 = pneg %p1123_p0  ;;  %p1129_p7 = scmp.lt.s32.totalorder %s1127_s24, %s1121_s15 }
 0x14d   : > { %p1130_p9 = por %p1129_p7, %p1128_p3 }
 0x14f   : > { %p1131_p13 = pnand %p1130_p9, %p1124_p5 }
 0x151   : > { %1134 = shalt.err (!%p1131_p13)
}
 0x152   : > { %s1135_s13 = scalar_lea.hbm %s1460_s17, 64  ;;  %s1139_s23 = scalar_lea.hbm %s1568_s8, 128 }
 0x153   : > { %p1136_p1 = scmp.ne.s32.totalorder %s1460_s17, %s1135_s13  ;;  %p1140_p11 = scmp.lt.s32.totalorder %s1460_s17, %s1568_s8 }
 0x154   : > { %p1141_p2 = scmp.lt.s32.totalorder %s1139_s23, %s1135_s13 }
 0x155   : > { %p1137_p8 = pnand %p1136_p1, %p1595_p6 }
 0x156   : > { %p1142_p4 = por %p1141_p2, %p1140_p11 }
 0x157   : > { %p1138_p10 = pneg %p1137_p8 }
 0x159   : > { %p1143_p12 = pnand %p1142_p4, %p1138_p10 }
 0x15b   : > { %1146 = shalt.err (!%p1143_p12)
}
 0x15c   : > { %907 = dma.vmem_to_hbm [thread:$0]  (%p1595_p6), %s1462_s28, 64, %s1460_s17, %s1492_s2   ;;  %v605_v24 = vpop.f32.mrf.mxu0 }
 0x15d   : > { %s409_s3 = scalar_lea.vmem [#allocation13], %s1434_s14  ;;  %v606_v25 = vadd.f32 %v847_v22, %v605_v24  ;;  %s1520_s1 = scalar_lea.hbm %s1569_s9, %s1444_s20 }
 0x15e   : > { %s663_s29 = sshll.u32 %s409_s3, 4  ;;  %v890_v26 = vpop.f32.mrf.mxu0  ;;  %s1235_s14 = smov [#allocation13]   ;;  %s664_s29 = int_to_ptr.vmem [resolvable:$true] %s663_s29 }
 0x15f   : > { %v611_v27 = vpack.c.bf16 %v606_v25, %v606_v25  ;;  %s1147_s24 = scalar_lea.vmem %s664_s29, 64  ;;  %s1151_s28 = sshll.u32 %s1235_s14, 4  ;;  %s1152_s28 = int_to_ptr.vmem [resolvable:$false] %s1151_s28 }
 0x160   : > { %v608_v28 = vpop.f32.mrf.mxu0  ;;  %p1148_p0 = scmp.ne.s32.totalorder %s664_s29, %s1147_s24  ;;  %s1153_s17 = scalar_lea.vmem %s1152_s28, 128 }
 0x161   : > { %612 = vst.msk [vmem:[%s409_s3] sm:$0xf] %vm481_vm2, %v611_v27  ;;  %p1154_p7 = scmp.lt.s32.totalorder %s664_s29, %s1152_s28  ;;  %p1155_p9 = scmp.lt.s32.totalorder %s1153_s17, %s1147_s24 }
 0x162   : > { %v891_v29 = vpop.f32.mrf.mxu0  ;;  %p1149_p5 = pnand %p1148_p0, %p1595_p6 }
 0x163   : > { %p1156_p13 = por %p1155_p9, %p1154_p7 }
 0x164   : > { %p1150_p3 = pneg %p1149_p5 }
 0x166   : > { %p1157_p1 = pnand %p1156_p13, %p1150_p3 }
 0x168   : > { %1160 = shalt.err (!%p1157_p1)
}
 0x169   : > { %s1161_s20 = scalar_lea.hbm %s1520_s1, 64  ;;  %s1165_s19 = scalar_lea.hbm %s1569_s9, 128 }
 0x16a   : > { %p1162_p8 = scmp.ne.s32.totalorder %s1520_s1, %s1161_s20  ;;  %p1166_p2 = scmp.lt.s32.totalorder %s1520_s1, %s1569_s9 }
 0x16b   : > { %p1167_p4 = scmp.lt.s32.totalorder %s1165_s19, %s1161_s20 }
 0x16c   : > { %p1163_p10 = pnand %p1162_p8, %p1595_p6 }
 0x16d   : > { %p1168_p12 = por %p1167_p4, %p1166_p2 }
 0x16e   : > { %p1164_p11 = pneg %p1163_p10 }
 0x170   : > { %p1169_p0 = pnand %p1168_p12, %p1164_p11 }
 0x172   : > { %1172 = shalt.err (!%p1169_p0)
}
 0x173   : > { %908 = dma.vmem_to_hbm [thread:$0]  (%p1595_p6), %s664_s29, 64, %s1520_s1, %s1492_s2  }
 0x174 PF: > { %s675_s25 = sand.u32 1, %s1211_s30   ;;  %p1597_p5 = scmp.ne.s32.totalorder %s1579_s16, 0 }
 0x175   : > { %p1598_p3 = scmp.ge.s32.totalorder %s1223_s12, 2  ;;  %s676_s3 = scalar_lea.sflag [#allocation4], %s675_s25 }
 0x177   : > { %p927_p7 = pnand %p1598_p3, %p1597_p5 }
 0x179   : > { %p928_p9 = pneg %p927_p7 }
 0x17b   : > { %1202 = dma.done.wait (%p928_p9), %s676_s3, 64  }
 0x17c   : > { %1204 = vsyncadd (%p928_p9), %s676_s3, 4294967232  ;;  %s1599_s15 = sadd.s32 4294967294, %s1223_s12  }
 0x17d   : > { %s684_s26 = sand.u32 1, %s1599_s15  }
 0x17e   : > { %s685_s24 = scalar_lea.sflag [#allocation12], %s684_s26 }
 0x17f   : > { %1206 = dma.done.wait (%p928_p9), %s685_s24, 128  }
 0x180   : > { %1208 = vsyncadd (%p928_p9), %s685_s24, 4294967168  ;;  %s1600_s21 = sld [smem:[#allocation19_spill]]  ;;  %p28_p6 = scmp.ge.s32.totalorder %s1368_s22, 4  }
 0x181   : > { %s1601_s30 = smov %s1215_s10  ;;  %s1602_s10 = smov %s1219_s11 }
 0x182   : > { %s1604_s12 = smov %s1368_s22  ;;  %30 = sbr.rel (!%p28_p6) target bundleno = 13 (0xd), region = 137 }
 0x186   : > { %s1603_s11 = smov %s1600_s21 }
 0x187   :  { %699 = vsyncpa [#allocation3], 1 }
 0x188   :  { %701 = vsyncpa [#allocation3 + $0x1], 1 }
 0x189   :  { %702 = vsyncpa [#allocation6], 1 }
 0x18a   :  { %703 = vsyncpa [#allocation9], 1 }
 0x18b   :  { %704 = vsyncpa [#allocation4], 1 }
 0x18c   :  { %706 = vsyncpa [#allocation4 + $0x1], 1 }
 0x18d   :  { %707 = vsyncpa [#allocation12], 1 }
 0x18e   :  { %709 = vsyncpa [#allocation12 + $0x1], 1 }

</bundles_post_ra>
